<compile_context>
chip_gen: v5e
topology: v5e:2x2
jax: 0.10.0
libtpu: 0.0.40
codegen_flags: <defaults>
</compile_context>

<pallas_src>
import functools

import jax
import jax.numpy as jnp
from jax import lax
from jax.experimental import pallas as pl
from jax.experimental.pallas import tpu as pltpu


# ---------------------------------------------------------------------------
# Weight-norm prep (hoisted: runs once at module construction).
#   w = g * v / ||v||   (norm over rows, per output column)
# ---------------------------------------------------------------------------
def _weight_norm_kernel(v_ref, g_ref, w_ref):
    v = v_ref[...]                                                  # (K*K*Cin, Cout)
    norm = jnp.sqrt(jnp.sum(v * v, axis=0, keepdims=True) + 1e-12)  # (1, Cout)
    w_ref[...] = v * (g_ref[...] / norm)


def weight_norm_deconv_to_conv2d(v, g):
    """v: (Cin, Cout, K, K) ConvTranspose2d direction, g: (Cout,) gains.

    Returns the conv-equivalent, weight-normalized kernel flattened to 2-D
    (HWIO order, spatially flipped taps):
      w2d[(kh*K + kw)*Cin + ci, co] = g[co] * v[ci, co, K-1-kh, K-1-kw] / ||v[:, co]||
    """
    Cin, Cout, K, _ = v.shape
    v_hwio = jnp.transpose(v[:, :, ::-1, ::-1], (2, 3, 0, 1))        # (K,K,Cin,Cout)
    v2d = v_hwio.reshape(K * K * Cin, Cout)
    return pl.pallas_call(
        _weight_norm_kernel,
        out_shape=jax.ShapeDtypeStruct((K * K * Cin, Cout), v.dtype),
        grid=(1,),
        in_specs=[pl.BlockSpec((K * K * Cin, Cout), lambda i: (0, 0)),
                  pl.BlockSpec((1, Cout), lambda i: (0, 0))],
        out_specs=pl.BlockSpec((K * K * Cin, Cout), lambda i: (0, 0)),
    )(v2d, g.reshape(1, Cout))


def _padded_cout(cout):
    """Lane-dense output channels: pad to a multiple of 128 only when the
    extra store traffic is bounded (<= 2x); otherwise keep masked stores."""
    if cout % 128 == 0:
        return cout
    up = ((cout + 127) // 128) * 128
    return up if up <= 2 * cout else cout


def prep_deconv_weights(v, g, b):
    """Cache weight-normalized, flipped, flattened, lane-padded bf16 weights."""
    Cin, Cout, K, _ = v.shape
    w2d = weight_norm_deconv_to_conv2d(v, g)
    cout_p = _padded_cout(Cout)
    if cout_p != Cout:
        w2d = jnp.pad(w2d, ((0, 0), (0, cout_p - Cout)))
        b = jnp.pad(b, ((0, cout_p - Cout),))
    return (w2d.astype(jnp.bfloat16),
            b.reshape(1, cout_p).astype(jnp.float32),
            Cout)


# ---------------------------------------------------------------------------
# In-kernel helpers.
# ---------------------------------------------------------------------------
def _apply_activation(x, activation):
    if activation is None:
        return x
    if activation == "relu":
        return jnp.maximum(x, 0.0)
    if activation == "elu":
        # exp of min(x, 0): avoids inf/NaN from the discarded where-branch.
        return jnp.where(x > 0, x, jnp.exp(jnp.minimum(x, 0.0)) - 1.0)
    if activation == "leaky_relu":
        return jnp.where(x > 0, x, 0.1 * x)   # wolf uses negative_slope=0.1
    raise ValueError(activation)


def _band_matmul(band, w_ref, *, K, TILE_H, Wo, Cin, use_tap):
    """band: (TILE_H+K-1, Wp, Cin) bf16  ->  f32 (TILE_H*Wo, Cout_p)."""
    M = TILE_H * Wo
    if use_tap:
        # Large Cin: K*K shifted-view matmuls, f32-accumulated; avoids the
        # lane-axis concatenate relayout.
        acc = None
        for kh in range(K):
            for kw in range(K):
                t = kh * K + kw
                piece = band[kh:kh + TILE_H, kw:kw + Wo, :].reshape(M, Cin)
                part = jnp.dot(piece, w_ref[t * Cin:(t + 1) * Cin, :],
                               preferred_element_type=jnp.float32)
                acc = part if acc is None else acc + part
        return acc
    # Small Cin: one im2col slab (bf16 end-to-end) and a single MXU matmul.
    pieces = [band[kh:kh + TILE_H, kw:kw + Wo, :]
              for kh in range(K) for kw in range(K)]
    slab = pieces[0] if len(pieces) == 1 else jnp.concatenate(pieces, axis=-1)
    return jnp.dot(slab.reshape(M, K * K * Cin), w_ref[...],
                   preferred_element_type=jnp.float32)


def _band_fetch(x_hbm, band_buf, sem, n, h_idx, slot, TILE_H, BAND):
    row0 = h_idx * TILE_H
    return pltpu.make_async_copy(
        x_hbm.at[n, pl.ds(row0, BAND), :, :], band_buf.at[slot], sem.at[slot])


def _deconv_body(x_hbm, w_ref, b_ref, res_ref, out_ref, band_buf, sem, *,
                 K, TILE_H, Wo, Cin, activation, use_tap):
    n = pl.program_id(0)
    h = pl.program_id(1)
    num_h = pl.num_programs(1)
    BAND = TILE_H + K - 1
    slot = lax.rem(h, 2)

    # Manual halo-band double buffer over the (sequential) h axis.
    @pl.when(h == 0)
    def _():
        _band_fetch(x_hbm, band_buf, sem, n, 0, 0, TILE_H, BAND).start()

    _band_fetch(x_hbm, band_buf, sem, n, h, slot, TILE_H, BAND).wait()

    @pl.when(h + 1 < num_h)
    def _():
        _band_fetch(x_hbm, band_buf, sem, n, h + 1, 1 - slot, TILE_H, BAND).start()

    band = band_buf[slot]                                     # (BAND, Wp, Cin) bf16
    acc = _band_matmul(band, w_ref, K=K, TILE_H=TILE_H, Wo=Wo,
                       Cin=Cin, use_tap=use_tap)              # (M, Cout_p) f32
    acc = acc + b_ref[...]
    if res_ref is not None:
        acc = acc + res_ref[0].astype(jnp.float32)            # fused residual add
    acc = _apply_activation(acc, activation)
    out_ref[0] = acc.astype(out_ref.dtype)


def _deconv_kernel(x_hbm, w_ref, b_ref, out_ref, band_buf, sem, **static):
    _deconv_body(x_hbm, w_ref, b_ref, None, out_ref, band_buf, sem, **static)


def _deconv_res_kernel(x_hbm, w_ref, b_ref, res_ref, out_ref, band_buf, sem, **static):
    _deconv_body(x_hbm, w_ref, b_ref, res_ref, out_ref, band_buf, sem, **static)


# ---------------------------------------------------------------------------
# Weight-normalized ConvTranspose2d (PyTorch semantics) on NHWC data.
# ---------------------------------------------------------------------------
def _vmem_capacity_bytes():
    try:
        return int(pltpu.get_tpu_info().vmem_capacity_bytes)
    except Exception:
        return 64 << 20     # conservative (v7x per-TC VMEM)


def deconv_wn_apply(x_nhwc, w2d, b2d, *, K, cout=None, stride=1, padding=0,
                    output_padding=0, activation=None, residual=None,
                    out_dtype=jnp.float32, tile_h=None, tap_matmul_min_cin=128):
    N, H, W, Cin = x_nhwc.shape
    Cout_p = w2d.shape[1]
    if cout is None:
        cout = Cout_p
    assert w2d.shape[0] == K * K * Cin
    w2d = w2d.astype(jnp.bfloat16)
    b2d = b2d.reshape(1, Cout_p).astype(jnp.float32)

    # conv_transpose == stride-1 conv over the zero-dilated, padded input.
    # bf16 before dilation/pad halves the preprocessing HBM traffic.
    xd = x_nhwc.astype(jnp.bfloat16)
    if stride > 1:
        Hd, Wd = (H - 1) * stride + 1, (W - 1) * stride + 1
        xd = jnp.zeros((N, Hd, Wd, Cin), jnp.bfloat16).at[:, ::stride, ::stride, :].set(xd)
    pad_lo = K - 1 - padding
    pad_hi = K - 1 - padding + output_padding
    xp = jnp.pad(xd, ((0, 0), (pad_lo, pad_hi), (pad_lo, pad_hi), (0, 0)))
    Hp, Wp = xp.shape[1], xp.shape[2]
    Ho, Wo = Hp - K + 1, Wp - K + 1

    cap = _vmem_capacity_bytes()
    # Band height: target M = TILE_H*Wo ~= 256 rows per MXU pass.
    if tile_h is None:
        tile_h = max(1, -(-256 // Wo))
    TILE_H = max(1, min(tile_h, Ho))

    def step_bytes(th):
        m = th * Wo
        band = 2 * (th + K - 1) * Wp * Cin * 2                # double-buffered band
        out_b = 2 * m * Cout_p * jnp.dtype(out_dtype).itemsize
        res_b = 2 * m * Cout_p * 2 if residual is not None else 0
        slab = 2 * m * K * K * Cin * 2                        # slab + concat temp
        acc = 2 * m * Cout_p * 4                              # f32 acc + act temp
        w_b = 2 * K * K * Cin * Cout_p * 2
        return band + out_b + res_b + slab + acc + w_b

    while TILE_H > 1 and step_bytes(TILE_H) > cap // 3:
        TILE_H = max(1, TILE_H // 2)

    BAND = TILE_H + K - 1
    M = TILE_H * Wo
    num_h = -(-Ho // TILE_H)
    Ho_pad = num_h * TILE_H
    need_H = Ho_pad + K - 1
    if need_H > Hp:
        xp = jnp.pad(xp, ((0, 0), (0, need_H - Hp), (0, 0), (0, 0)))

    grid = (N, num_h)
    x_spec = pl.BlockSpec(memory_space=pl.ANY)          # raw HBM; manual band DMA
    w_spec = pl.BlockSpec((K * K * Cin, Cout_p), lambda n, h: (0, 0))
    b_spec = pl.BlockSpec((1, Cout_p), lambda n, h: (0, 0))
    out_spec = pl.BlockSpec((1, M, Cout_p), lambda n, h: (n, h, 0))
    out_shape = jax.ShapeDtypeStruct((N, Ho_pad * Wo, Cout_p), out_dtype)

    use_tap = Cin >= tap_matmul_min_cin
    static = dict(K=K, TILE_H=TILE_H, Wo=Wo, Cin=Cin,
                  activation=activation, use_tap=use_tap)

    if residual is None:
        kernel = functools.partial(_deconv_kernel, **static)
        in_specs = [x_spec, w_spec, b_spec]
        operands = (xp, w2d, b2d)
    else:
        assert residual.shape == (N, Ho, Wo, cout), residual.shape
        res = residual.astype(jnp.bfloat16)
        if Cout_p != cout:
            res = jnp.pad(res, ((0, 0), (0, 0), (0, 0), (0, Cout_p - cout)))
        if Ho_pad > Ho:
            res = jnp.pad(res, ((0, 0), (0, Ho_pad - Ho), (0, 0), (0, 0)))
        res = res.reshape(N, Ho_pad * Wo, Cout_p)
        kernel = functools.partial(_deconv_res_kernel, **static)
        res_spec = pl.BlockSpec((1, M, Cout_p), lambda n, h: (n, h, 0))
        in_specs = [x_spec, w_spec, b_spec, res_spec]
        operands = (xp, w2d, b2d, res)

    vmem_limit = int(min(max(2 * step_bytes(TILE_H), 16 << 20), int(cap * 0.9)))

    out = pl.pallas_call(
        kernel,
        out_shape=out_shape,
        grid=grid,
        in_specs=in_specs,
        out_specs=out_spec,
        scratch_shapes=[pltpu.VMEM((2, BAND, Wp, Cin), jnp.bfloat16),
                        pltpu.SemaphoreType.DMA((2,))],
        compiler_params=pltpu.CompilerParams(
            # h must be sequential ("arbitrary") for the manual band
            # double-buffer; N is megacore-parallel (v7x: 2 TCs share batches).
            dimension_semantics=("parallel", "arbitrary"),
            vmem_limit_bytes=vmem_limit),
    )(*operands)

    out = out.reshape(N, Ho_pad, Wo, Cout_p)
    return out[:, :Ho, :, :cout]


# ---------------------------------------------------------------------------
# The block.
# ---------------------------------------------------------------------------
class DeResNetBlockWeightNorm:
    """JAX/Pallas port of wolf's DeResNetBlockWeightNorm forward pass."""

    def __init__(self, key, inplanes, planes, stride=1, output_padding=0,
                 activation="relu"):
        assert activation in ("relu", "elu", "leaky_relu")
        self.inplanes, self.planes = inplanes, planes
        self.stride, self.output_padding = stride, output_padding
        self.activation = activation

        ks = jax.random.split(key, 9)

        def deconv_params(kv, kg, kb, cin, c_out, ksz):
            v = 0.05 * jax.random.normal(kv, (cin, c_out, ksz, ksz), jnp.float32)
            g = jax.random.uniform(kg, (c_out,), jnp.float32, 0.5, 1.5)
            b = 0.1 * jax.random.normal(kb, (c_out,), jnp.float32)
            return v, g, b

        # deconv1: 3x3, stride, output_padding, padding=1
        self.v1, self.g1, self.b1 = deconv_params(ks[0], ks[1], ks[2], inplanes, planes, 3)
        # deconv2: 3x3, stride=1, padding=1
        self.v2, self.g2, self.b2 = deconv_params(ks[3], ks[4], ks[5], planes, planes, 3)
        self.has_downsample = (stride != 1) or (inplanes != planes)
        if self.has_downsample:
            # 1x1 deconv, stride, output_padding, padding=0
            self.vd, self.gd, self.bd = deconv_params(ks[6], ks[7], ks[8], inplanes, planes, 1)

        # Weight norm hoisted out of the forward path; weights cached bf16,
        # lane-padded for dense output stores.
        self.w1, self.b1_2d, _ = prep_deconv_weights(self.v1, self.g1, self.b1)
        self.w2, self.b2_2d, _ = prep_deconv_weights(self.v2, self.g2, self.b2)
        if self.has_downsample:
            self.wd, self.bd_2d, _ = prep_deconv_weights(self.vd, self.gd, self.bd)

    def __call__(self, x_nchw):
        # TODO(synk): drop these transposes if embedded in an NHWC pipeline.
        x = jnp.transpose(x_nchw, (0, 2, 3, 1)).astype(jnp.bfloat16)
        # Intermediates are written in bf16 (consumer re-casts to bf16 anyway).
        out = deconv_wn_apply(x, self.w1, self.b1_2d, K=3, cout=self.planes,
                              stride=self.stride, padding=1,
                              output_padding=self.output_padding,
                              activation=self.activation, out_dtype=jnp.bfloat16)
        if self.has_downsample:
            residual = deconv_wn_apply(x, self.wd, self.bd_2d, K=1, cout=self.planes,
                                       stride=self.stride, padding=0,
                                       output_padding=self.output_padding,
                                       activation=None, out_dtype=jnp.bfloat16)
        else:
            residual = x
        # deconv2 + residual add + final activation fused in a single kernel.
        out = deconv_wn_apply(out, self.w2, self.b2_2d, K=3, cout=self.planes,
                              stride=1, padding=1, output_padding=0,
                              activation=self.activation, residual=residual,
                              out_dtype=jnp.float32)
        return jnp.transpose(out, (0, 3, 1, 2))                  # NHWC -> NCHW


# ---------------------------------------------------------------------------
# Pure-JAX reference (lax.conv_general_dilated, NHWC), mirroring the kernel's
# numerics (bf16 operands / intermediates, f32 accumulation).
# ---------------------------------------------------------------------------
def _ref_act(x, activation):
    if activation == "relu":
        return jnp.maximum(x, 0.0)
    if activation == "elu":
        return jnp.where(x > 0, x, jnp.exp(jnp.minimum(x, 0.0)) - 1.0)
    return jnp.where(x > 0, x, 0.1 * x)


def _ref_deconv(x_nhwc, w2d, b2d, cout, K, stride, padding, output_padding):
    Cin = x_nhwc.shape[-1]
    Cout_p = w2d.shape[1]
    w_hwio = w2d.astype(jnp.bfloat16).reshape(K, K, Cin, Cout_p)
    pad = (K - 1 - padding, K - 1 - padding + output_padding)
    y = lax.conv_general_dilated(
        x_nhwc.astype(jnp.bfloat16), w_hwio, window_strides=(1, 1),
        padding=(pad, pad), lhs_dilation=(stride, stride),
        dimension_numbers=("NHWC", "HWIO", "NHWC"),
        preferred_element_type=jnp.float32)
    y = y + b2d.reshape(1, 1, 1, Cout_p).astype(jnp.float32)
    return y[..., :cout]


def _ref_block(blk, x_nchw):
    x = jnp.transpose(x_nchw, (0, 2, 3, 1)).astype(jnp.bfloat16)
    out1 = _ref_act(_ref_deconv(x, blk.w1, blk.b1_2d, blk.planes, 3, blk.stride,
                                1, blk.output_padding), blk.activation)
    out1 = out1.astype(jnp.bfloat16)
    out2 = _ref_deconv(out1, blk.w2, blk.b2_2d, blk.planes, 3, 1, 1, 0)
    if blk.has_downsample:
        res = _ref_deconv(x, blk.wd, blk.bd_2d, blk.planes, 1, blk.stride, 0,
                          blk.output_padding).astype(jnp.bfloat16)
    else:
        res = x
    out = _ref_act(out2 + res.astype(jnp.float32), blk.activation)
    return jnp.transpose(out, (0, 3, 1, 2))


def _ref_wn2d(v, g):
    Cin, Cout, K, _ = v.shape
    norm = jnp.sqrt(jnp.sum(v * v, axis=(0, 2, 3)) + 1e-12)
    w = v * (g / norm).reshape(1, Cout, 1, 1)
    return jnp.transpose(w[:, :, ::-1, ::-1], (2, 3, 0, 1)).reshape(K * K * Cin, Cout)


if __name__ == "__main__":
    key = jax.random.PRNGKey(0)
    ks = jax.random.split(key, 8)

    # Case 1: stride=1, inplanes != planes (1x1 downsample), ReLU.
    N, inplanes, planes, H, W = 2, 4, 8, 16, 16
    blk1 = DeResNetBlockWeightNorm(ks[0], inplanes, planes, stride=1,
                                   output_padding=0, activation="relu")
    x1 = jax.random.normal(ks[1], (N, inplanes, H, W), jnp.float32)
    out1 = jax.block_until_ready(blk1(x1))
    ref1 = _ref_block(blk1, x1)
    assert out1.shape == ref1.shape == (N, planes, H, W)
    assert jnp.allclose(out1, ref1, atol=1e-2, rtol=1e-2), \
        float(jnp.max(jnp.abs(out1 - ref1)))

    # Weight-norm kernel sanity check against the plain-JAX formula.
    assert jnp.allclose(blk1.w1[:, :planes].astype(jnp.float32),
                        _ref_wn2d(blk1.v1, blk1.g1), atol=1e-2, rtol=1e-2)

    # Case 2: stride=2 + output_padding=1, ELU (exercises the dilation path).
    blk2 = DeResNetBlockWeightNorm(ks[2], 4, 8, stride=2, output_padding=1,
                                   activation="elu")
    x2 = jax.random.normal(ks[3], (2, 4, 8, 8), jnp.float32)
    out2 = jax.block_until_ready(blk2(x2))
    ref2 = _ref_block(blk2, x2)
    assert out2.shape == ref2.shape == (2, 8, 16, 16)
    assert jnp.allclose(out2, ref2, atol=1e-2, rtol=1e-2), \
        float(jnp.max(jnp.abs(out2 - ref2)))

    # Case 3: identity residual (inplanes == planes), leaky_relu.
    blk3 = DeResNetBlockWeightNorm(ks[4], 8, 8, stride=1, output_padding=0,
                                   activation="leaky_relu")
    x3 = jax.random.normal(ks[5], (1, 8, 16, 16), jnp.float32)
    out3 = jax.block_until_ready(blk3(x3))
    ref3 = _ref_block(blk3, x3)
    assert jnp.allclose(out3, ref3, atol=1e-2, rtol=1e-2), \
        float(jnp.max(jnp.abs(out3 - ref3)))

    # Standalone deconv checks for the specialized kernel paths.
    def check_deconv(kp, cin, cout, hw, *, stride=1, padding=1, opad=0, K=3,
                     tile_h=None, tap_min=128, with_res=False, act="relu"):
        kv, kg, kb, kxx, kr = jax.random.split(kp, 5)
        v = 0.05 * jax.random.normal(kv, (cin, cout, K, K), jnp.float32)
        g = jax.random.uniform(kg, (cout,), jnp.float32, 0.5, 1.5)
        b = 0.1 * jax.random.normal(kb, (cout,), jnp.float32)
        w2d, b2d, _ = prep_deconv_weights(v, g, b)
        x = jax.random.normal(kxx, (2, hw, hw, cin), jnp.float32).astype(jnp.bfloat16)
        ref = _ref_deconv(x, w2d, b2d, cout, K, stride, padding, opad)
        res = None
        if with_res:
            res = jax.random.normal(kr, ref.shape, jnp.float32).astype(jnp.bfloat16)
            ref = ref + res.astype(jnp.float32)
        ref = _ref_act(ref, act)
        got = deconv_wn_apply(x, w2d, b2d, K=K, cout=cout, stride=stride,
                              padding=padding, output_padding=opad, activation=act,
                              residual=res, out_dtype=jnp.float32, tile_h=tile_h,
                              tap_matmul_min_cin=tap_min)
        got = jax.block_until_ready(got)
        assert got.shape == ref.shape, (got.shape, ref.shape)
        assert jnp.allclose(got, ref, atol=1e-2, rtol=1e-2), \
            float(jnp.max(jnp.abs(got - ref)))

    # (a) multi-band path (num_h > 1, manual double-buffer) with fused residual.
    check_deconv(ks[6], 8, 8, 24, tile_h=8, with_res=True)
    # (b) per-tap matmul path (forced).
    check_deconv(ks[6], 8, 8, 16, tap_min=1)
    # (c) lane-padded Cout path (96 -> 128, dense output stores).
    check_deconv(ks[7], 8, 96, 16)

    print("KERNEL_OK")
</pallas_src>

<mosaic_0001>
module attributes {stable_mosaic.version = 11 : i64} {
  func.func @_weight_norm_kernel(%arg0: i32, %arg1: memref<36x8xf32, #tpu.memory_space<vmem>>, %arg2: memref<1x8xf32, #tpu.memory_space<vmem>>, %arg3: memref<36x8xf32, #tpu.memory_space<vmem>>) attributes {dimension_semantics = [#tpu.dimension_semantics<arbitrary>], iteration_bounds = array<i64: 1>, scalar_prefetch = 0 : i64, scratch_operands = 0 : i64, tpu.core_type = #tpu.core_type<tc>, window_params = [{pipeline_mode = #tpu.pipeline_mode<synchronous>, transform_indices = @transform_0, window_bounds = array<i64: 36, 8>}, {pipeline_mode = #tpu.pipeline_mode<synchronous>, transform_indices = @transform_1, window_bounds = array<i64: 1, 8>}, {pipeline_mode = #tpu.pipeline_mode<synchronous>, transform_indices = @transform_2, window_bounds = array<i64: 36, 8>}]} {
    %c0 = arith.constant 0 : index
    %c0_0 = arith.constant 0 : index
    %0 = vector.load %arg1[%c0, %c0_0] : memref<36x8xf32, #tpu.memory_space<vmem>>, vector<36x8xf32>
    %1 = arith.mulf %0, %0 : vector<36x8xf32>
    %cst = arith.constant dense<0.000000e+00> : vector<8xf32>
    %2 = vector.multi_reduction <add>, %1, %cst [0] : vector<36x8xf32> to vector<8xf32>
    %3 = vector.shape_cast %2 : vector<8xf32> to vector<1x8xf32>
    %cst_1 = arith.constant 9.99999996E-13 : f32
    %4 = vector.broadcast %cst_1 : f32 to vector<1x8xf32>
    %5 = arith.addf %3, %4 : vector<1x8xf32>
    %6 = math.sqrt %5 : vector<1x8xf32>
    %c0_2 = arith.constant 0 : index
    %c0_3 = arith.constant 0 : index
    %7 = vector.load %arg2[%c0_2, %c0_3] : memref<1x8xf32, #tpu.memory_space<vmem>>, vector<1x8xf32>
    %8 = arith.divf %7, %6 : vector<1x8xf32>
    %9 = vector.broadcast %8 : vector<1x8xf32> to vector<36x8xf32>
    %10 = arith.mulf %0, %9 : vector<36x8xf32>
    %c0_4 = arith.constant 0 : index
    %c0_5 = arith.constant 0 : index
    %11 = vector.load %arg3[%c0_4, %c0_5] : memref<36x8xf32, #tpu.memory_space<vmem>>, vector<36x8xf32>
    tpu.vector_store %arg3[%c0_4, %c0_5], %10 {strides = array<i32>} : memref<36x8xf32, #tpu.memory_space<vmem>>, vector<36x8xf32>,
    return
  }
  func.func @transform_0(%arg0: i32) -> (i32, i32) {
    %c0_i32 = arith.constant 0 : i32
    %c0_i32_0 = arith.constant 0 : i32
    %c0_i32_1 = arith.constant 0 : i32
    return %c0_i32, %c0_i32_0 : i32, i32
  }
  func.func @transform_1(%arg0: i32) -> (i32, i32) {
    %c0_i32 = arith.constant 0 : i32
    %c0_i32_0 = arith.constant 0 : i32
    %c0_i32_1 = arith.constant 0 : i32
    return %c0_i32, %c0_i32_0 : i32, i32
  }
  func.func @transform_2(%arg0: i32) -> (i32, i32) {
    %c0_i32 = arith.constant 0 : i32
    %c0_i32_0 = arith.constant 0 : i32
    %c0_i32_1 = arith.constant 0 : i32
    return %c0_i32, %c0_i32_0 : i32, i32
  }
}

</mosaic_0001>

<bundles_post_ra>
// kernel: tpu_custom_call.1
= control target key start
LH: loop header
LB: loop body
LE: loop exit
PB: predicated region body
PF: predicated region fallthrough
CT: control target
= control target key end

     0   :  { %vm21_vm0 = vcmask 64512   ;;  %vm29_vm1 = vcmask 60416   ;;  %s146_s0 = inlined_call_operand.vmem [shape: f32[36,8], index: 0, kind: input, shape index: {}]   ;;  %s147_s1 = inlined_call_operand.vmem [shape: f32[1,8], index: 1, kind: input, shape index: {}]   ;;  %s148_s2 = inlined_call_operand.vmem [shape: f32[36,8], index: 2, kind: output, shape index: {}]  }
   0x1   :  { %v11_v0 = vld [vmem:[%s146_s0] sm:$0xff]  ;;  %v12_v1 = vld [vmem:[%s146_s0 + $0x8] sm:$0xff]  ;;  %v13_v2 = vld [vmem:[%s146_s0 + $0x10] sm:$0xff] }
   0x2   :  { %v14_v3 = vld [vmem:[%s146_s0 + $0x18] sm:$0xff]  ;;  %v15_v4 = vld [vmem:[%s146_s0 + $0x20] sm:$0xf]  ;;  %v16_v5 = vmul.f32 %v11_v0, %v11_v0  ;;  %v17_v6 = vmul.f32 %v12_v1, %v12_v1  ;;  %v18_v7 = vmul.f32 %v13_v2, %v13_v2 }
   0x3   :  { %v19_v8 = vmul.f32 %v14_v3, %v14_v3  ;;  %v20_v9 = vmul.f32 %v15_v4, %v15_v4  ;;  %v51_v44 = vld [vmem:[%s147_s1] sm:$0x1] }
   0x4   :  { %v22_v10 = vsel %vm21_vm0, %v16_v5, 0.0  ;;  %v23_v11 = vsel %vm21_vm0, %v17_v6, 0.0  ;;  %v25_v12 = vsel %vm21_vm0, %v18_v7, 0.0 }
   0x5   :  { %v24_v13 = vadd.f32 %v23_v11, %v22_v10  ;;  %v27_v14 = vsel %vm21_vm0, %v19_v8, 0.0  ;;  %v30_v16 = vsel %vm29_vm1, %v20_v9, 0.0 }
   0x7   :  { %v26_v15 = vadd.f32 %v25_v12, %v24_v13 }
   0x9   :  { %v28_v17 = vadd.f32 %v27_v14, %v26_v15 }
   0xb   :  { %v31_v18 = vadd.f32 %v30_v16, %v28_v17 }
   0xd   :  { %v32_v19 = vrot.slane %v31_v18, 4 }
   0xf   :  { %v33_v20 = vadd.f32 %v32_v19, %v31_v18 }
  0x11   :  { %v34_v21 = vrot.slane %v33_v20, 2 }
  0x13   :  { %v35_v22 = vadd.f32 %v34_v21, %v33_v20 }
  0x15   :  { %v36_v23 = vrot.slane %v35_v22, 1 }
  0x17   :  { %v37_v24 = vadd.f32 %v36_v23, %v35_v22 }
  0x19   :  { %v38_v25 = vadd.f32 1e-12, %v37_v24 }
  0x1b   :  { %84 = vrsqrt.f32 %v38_v25  ;;  %vm46_vm2 = vcmp.eq.f32.partialorder %v38_v25, inf  ;;  %v49_v32 = vand.u32 2147483648, %v38_v25  ;;  %vm48_vm3 = vcmp.eq.f32.partialorder %v38_v25, 0.0 }
  0x21   :  { %v85_v26 = vpop.eup %84 }
  0x22   :  { %v40_v27 = vmul.f32 %v85_v26, %v38_v25 }
  0x24   :  { %v41_v28 = vmul.f32 %v85_v26, %v40_v27 }
  0x26   :  { %v42_v29 = vmul.f32 0.5, %v41_v28 }
  0x28   :  { %v43_v30 = vsub.f32 1.5, %v42_v29 }
  0x2a   :  { %v44_v31 = vmul.f32 %v85_v26, %v43_v30 }
  0x2c   :  { %v45_v33 = vmul.f32 %v44_v31, %v38_v25 }
  0x2e   :  { %v47_v34 = vsel %vm46_vm2, %v38_v25, %v45_v33 }
  0x2f   :  { %v50_v35 = vsel %vm48_vm3, %v49_v32, %v47_v34 }
  0x30   :  { %86 = vrcp.f32 %v50_v35  ;;  %v63_v38 = vand.u32 2147483648, %v50_v35  ;;  %vm57_vm4 = vweird.f32 %v50_v35  ;;  %v61_v40 = vand.u32 2147483647, %v50_v35 }
  0x32   :  { %v64_v42 = vor.u32 1.1754944e-38, %v63_v38  ;;  %vm62_vm7 = vcmp.eq.f32.partialorder %v61_v40, 8.507059e+37 }
  0x36   :  { %v87_v36 = vpop.eup %86 }
  0x37   :  { %v53_v37 = vmul.f32 %v87_v36, %v50_v35  ;;  %vm58_vm5 = vweird.f32 %v87_v36 }
  0x38   :  { %vm59_vm6 = vmor %vm57_vm4, %vm58_vm5 }
  0x39   :  { %v54_v39 = vsub.f32 1.0, %v53_v37 }
  0x3b   :  { %v55_v41 = vmul.f32 %v87_v36, %v54_v39 }
  0x3d   :  { %v56_v43 = vadd.f32 %v87_v36, %v55_v41 }
  0x3f   :  { %v60_v45 = vsel %vm59_vm6, %v87_v36, %v56_v43 }
  0x40   :  { %v65_v46 = vsel %vm62_vm7, %v64_v42, %v60_v45 }
  0x41   :  { %v66_v47 = vmul.f32 %v65_v46, %v51_v44 }
  0x43   :  { %v68_v48 = vperm.slane %v66_v47, 0 }
  0x45   :  { %v70_v49 = vmul.f32 %v68_v48, %v11_v0  ;;  %v71_v50 = vmul.f32 %v68_v48, %v12_v1  ;;  %v72_v51 = vmul.f32 %v68_v48, %v13_v2  ;;  %v73_v52 = vmul.f32 %v68_v48, %v14_v3 }
  0x46   :  { %v74_v53 = vmul.f32 %v68_v48, %v15_v4 }
  0x47   :  { %75 = vst.msk [vmem:[%s148_s2] sm:$0xff] %vm21_vm0, %v70_v49 }
  0x48   :  { %76 = vst.msk [vmem:[%s148_s2 + $0x8] sm:$0xff] %vm21_vm0, %v71_v50 }
  0x49   :  { %77 = vst.msk [vmem:[%s148_s2 + $0x10] sm:$0xff] %vm21_vm0, %v72_v51 }
  0x4a   :  { %78 = vst.msk [vmem:[%s148_s2 + $0x18] sm:$0xff] %vm21_vm0, %v73_v52 }
  0x4b   :  { %79 = vst.msk [vmem:[%s148_s2 + $0x20] sm:$0xf] %vm29_vm1, %v74_v53 }

</bundles_post_ra>
